<compile_context>
chip_gen: v5e
topology: v5e:2x2
jax: 0.10.0
libtpu: 0.0.40
codegen_flags: <defaults>
</compile_context>

<pallas_src>
import math
from functools import partial

import jax
import jax.numpy as jnp
from jax import lax
from jax.experimental import pallas as pl
from jax.experimental.pallas import tpu as pltpu


# ----------------------------------------------------------------------------
# Fused Pallas kernel: LSTM (final hidden) + handcrafted-feature concat
# ----------------------------------------------------------------------------
def _feature_extractor_kernel(s_ref, wih_ref, whh_ref, b_ref, feat_ref,
                              ex_ref, *, matmul_dtype):
    # s_ref    : (T, B, F)      TIME-MAJOR input sequence
    # wih_ref  : (F, 4H)        input->gate weights, pre-transposed, lane-dense
    # whh_ref  : (H, 4H)        hidden->gate weights, pre-transposed, lane-dense
    # b_ref    : (1, 4H)        combined bias (b_ih + b_hh)
    # feat_ref : (B, n_hf)      handcrafted features
    # ex_ref   : (B, H + n_hf)  output: concat(final hidden h_T, feat)
    T, B, F = s_ref.shape
    H = whh_ref.shape[0]
    H4 = 4 * H

    # --- Input projection for all T timesteps in ONE matmul (bias folded). ---
    # Time-major reshape: step t owns rows [t*B, (t+1)*B) of x_gates, so the
    # per-step slice inside the recurrence is a contiguous sublane slice.
    x = s_ref[...].reshape(T * B, F).astype(matmul_dtype)           # (T*B, F)
    wih = wih_ref[...].astype(matmul_dtype)                          # (F, 4H)
    x_gates = (jnp.dot(x, wih, preferred_element_type=jnp.float32)
               + b_ref[...])                                         # (T*B, 4H)

    whh = whh_ref[...].astype(matmul_dtype)                          # (H, 4H)

    # Static lane mask selecting the g-gate columns (PyTorch order [i, f, g, o]).
    lane = lax.broadcasted_iota(jnp.int32, (B, H4), 1)
    g_lanes = (lane >= 2 * H) & (lane < 3 * H)

    h = jnp.zeros((B, H), jnp.float32)
    c = jnp.zeros((B, H), jnp.float32)

    # Fully-unrolled recurrence: only dot(h, W_hh^T) + one tanh pass are on the
    # serial chain.  sigmoid(x) = 0.5 * (1 + tanh(x/2)) lets all four gates
    # share a single full-width EUP tanh dispatch per step.
    for t in range(T):
        gates = x_gates[t * B:(t + 1) * B, :] + jnp.dot(
            h.astype(matmul_dtype), whh,
            preferred_element_type=jnp.float32)                      # (B, 4H)
        pre = jnp.where(g_lanes, gates, gates * 0.5)   # halve non-g lanes
        y = jnp.tanh(pre)                              # single EUP pass, 4H wide
        act = jnp.where(g_lanes, y, y * 0.5 + 0.5)     # sigmoid fixup (VALU)
        # Quarter-width lane slices: lowered to XLU lane extraction, which has
        # its own issue slot and overlaps MXU/EUP work.
        i_g = act[:, 0 * H:1 * H]
        f_g = act[:, 1 * H:2 * H]
        g_g = act[:, 2 * H:3 * H]
        o_g = act[:, 3 * H:4 * H]
        c = f_g * c + i_g * g_g
        h = o_g * jnp.tanh(c)

    ex_ref[...] = jnp.concatenate(
        [h, feat_ref[...].astype(jnp.float32)], axis=1).astype(ex_ref.dtype)


def lstm_feature_kernel_call(s_btf, feat_2d, wih_t, whh_t, bias,
                             *, matmul_dtype=jnp.bfloat16):
    """Fused LSTM(final hidden) + feature concat.

    s_btf   : (B, T, F) float input (batch_first, as the module receives it)
    feat_2d : (B, n_hf)
    wih_t   : (F, 4H), whh_t: (H, 4H), bias: (1, 4H)  -- pre-prepared, cached
    Returns ex (B, H + n_hf) = concat(final hidden h_T, feat).

    matmul_dtype=jnp.bfloat16 (default) uses the bf16-native MXU path on
    v5e/v6e/v7x (accumulation and all elementwise math stay f32);
    matmul_dtype=jnp.float32 gives exact parity with the f32 reference.
    """
    B, T, F = s_btf.shape
    H = whh_t.shape[0]
    n_hf = feat_2d.shape[-1]

    # Tiny (T*B*F element) time-major transpose so the kernel's per-step gate
    # slice is contiguous; this is off the serial recurrence chain.
    s_tbf = jnp.transpose(s_btf.astype(jnp.float32), (1, 0, 2))      # (T, B, F)

    kernel = partial(_feature_extractor_kernel, matmul_dtype=matmul_dtype)
    vmem = pl.BlockSpec(memory_space=pltpu.MemorySpace.VMEM)

    # Grid-less pallas_call: everything fits trivially in VMEM, no pipeline
    # machinery needed at these sizes.
    ex = pl.pallas_call(
        kernel,
        out_shape=jax.ShapeDtypeStruct((B, H + n_hf), jnp.float32),
        in_specs=[vmem, vmem, vmem, vmem, vmem],
        out_specs=vmem,
    )(s_tbf, wih_t, whh_t, bias, feat_2d.astype(jnp.float32))
    return ex


# ----------------------------------------------------------------------------
# FeatureExtractor: params + forward (mirrors the PyTorch module semantics)
# ----------------------------------------------------------------------------
class Args:
    n_features = 4
    n_handcrafted_features = 4
    use_handcraft = 1
    n_hidden = 32
    n_rnn_layers = 1
    bidirectional = False
    rnn_directions = 1


def init_feature_extractor_params(args, key):
    """Deterministic init matching nn.LSTM's uniform(-1/sqrt(H), 1/sqrt(H))."""
    H, F = args.n_hidden, args.n_features
    bound = 1.0 / math.sqrt(H)
    k1, k2, k3, k4 = jax.random.split(key, 4)
    return {
        "w_ih": jax.random.uniform(k1, (4 * H, F), jnp.float32, -bound, bound),
        "w_hh": jax.random.uniform(k2, (4 * H, H), jnp.float32, -bound, bound),
        "b_ih": jax.random.uniform(k3, (4 * H,), jnp.float32, -bound, bound),
        "b_hh": jax.random.uniform(k4, (4 * H,), jnp.float32, -bound, bound),
    }


def prepare_kernel_params(params):
    """One-time weight transpose + bias fold (cache this; do NOT redo per call)."""
    H4 = params["w_ih"].shape[0]
    return {
        "wih_t": jnp.transpose(params["w_ih"]).astype(jnp.float32),   # (F, 4H)
        "whh_t": jnp.transpose(params["w_hh"]).astype(jnp.float32),   # (H, 4H)
        "bias": (params["b_ih"] + params["b_hh"]).reshape(1, H4).astype(jnp.float32),
    }


def feature_extractor_forward(kparams, args, s, feat, mode,
                              *, matmul_dtype=jnp.bfloat16):
    """Replicates FeatureExtractor.forward.

    batch mode : s (B, T, F), feat (B, 1, n_hf)
    single mode: s (T, F),    feat (n_hf,)
    Returns (extract_states, lstm_output).
    """
    assert args.n_rnn_layers == 1 and not args.bidirectional, (
        "Pallas kernel implements single-layer unidirectional LSTM only")
    n_hf = args.n_handcrafted_features
    H = args.n_hidden

    if mode == "batch":
        B = s.shape[0]
        feat_2d = (feat[:, 0, :] if args.use_handcraft == 1
                   else jnp.zeros((B, n_hf), jnp.float32))
        ex = lstm_feature_kernel_call(
            s, feat_2d, kparams["wih_t"], kparams["whh_t"], kparams["bias"],
            matmul_dtype=matmul_dtype)
        # PyTorch: hid (L*D, B, H) -> hid.view(B, -1); for L*D == 1 this is h_T,
        # which is the first H columns of ex.
        lstm_output = ex[:, :H]
        extract_states = ex if args.use_handcraft == 1 else lstm_output
    else:
        s_b = s[None, :, :]                                    # (1, T, F)
        feat_2d = (feat.reshape(1, n_hf) if args.use_handcraft == 1
                   else jnp.zeros((1, n_hf), jnp.float32))
        ex = lstm_feature_kernel_call(
            s_b, feat_2d, kparams["wih_t"], kparams["whh_t"], kparams["bias"],
            matmul_dtype=matmul_dtype)
        lstm_output = ex[0, :H]                                # (H,)
        extract_states = ex[0] if args.use_handcraft == 1 else lstm_output
    return extract_states, lstm_output


# ----------------------------------------------------------------------------
# Pure-JAX reference LSTM for correctness check
# ----------------------------------------------------------------------------
def _ref_lstm_final_hidden(s_btf, w_ih, w_hh, b_ih, b_hh):
    B, T, F = s_btf.shape
    H = w_hh.shape[1]

    def step(carry, x_t):
        h, c = carry
        gates = x_t @ w_ih.T + h @ w_hh.T + b_ih + b_hh
        i = jax.nn.sigmoid(gates[:, 0 * H:1 * H])
        f = jax.nn.sigmoid(gates[:, 1 * H:2 * H])
        g = jnp.tanh(gates[:, 2 * H:3 * H])
        o = jax.nn.sigmoid(gates[:, 3 * H:4 * H])
        c = f * c + i * g
        h = o * jnp.tanh(c)
        return (h, c), None

    init = (jnp.zeros((B, H), jnp.float32), jnp.zeros((B, H), jnp.float32))
    (h, _), _ = lax.scan(step, init, jnp.transpose(s_btf, (1, 0, 2)))
    return h


if __name__ == "__main__":
    args = Args()
    B, T = 2, 8

    key = jax.random.PRNGKey(0)
    k_params, k_s, k_feat = jax.random.split(key, 3)

    params = init_feature_extractor_params(args, k_params)
    kparams = prepare_kernel_params(params)   # cached once, reused every call
    s = jax.random.normal(k_s, (B, T, args.n_features), jnp.float32)
    feat = jax.random.normal(
        k_feat, (B, 1, args.n_handcrafted_features), jnp.float32
    )

    hid_ref = _ref_lstm_final_hidden(
        s, params["w_ih"], params["w_hh"], params["b_ih"], params["b_hh"]
    )
    ref_extract = jnp.concatenate([hid_ref, feat[:, 0, :]], axis=1)

    # ---- batch mode, bf16 MXU path (default) ----
    extract_states, lstm_output = feature_extractor_forward(
        params := kparams, args, s, feat, mode="batch"
    )
    jax.block_until_ready((extract_states, lstm_output))
    assert extract_states.shape == (B, args.n_hidden + args.n_handcrafted_features)
    assert lstm_output.shape == (B, args.n_hidden)
    assert jnp.allclose(lstm_output, hid_ref, atol=5e-2, rtol=5e-2)
    assert jnp.allclose(extract_states, ref_extract, atol=5e-2, rtol=5e-2)

    # ---- batch mode, f32 path (exact parity with the reference) ----
    es_f32, lo_f32 = feature_extractor_forward(
        kparams, args, s, feat, mode="batch", matmul_dtype=jnp.float32
    )
    jax.block_until_ready((es_f32, lo_f32))
    assert jnp.allclose(lo_f32, hid_ref, atol=1e-4, rtol=1e-4)
    assert jnp.allclose(es_f32, ref_extract, atol=1e-4, rtol=1e-4)

    # ---- single mode ----
    es_s, lo_s = feature_extractor_forward(
        kparams, args, s[0], feat[0, 0, :], mode="single"
    )
    jax.block_until_ready((es_s, lo_s))
    hid_ref_s = hid_ref[0]
    assert lo_s.shape == (args.n_hidden,)
    assert es_s.shape == (args.n_hidden + args.n_handcrafted_features,)
    assert jnp.allclose(lo_s, hid_ref_s, atol=5e-2, rtol=5e-2)
    assert jnp.allclose(
        es_s, jnp.concatenate([hid_ref_s, feat[0, 0, :]], axis=0),
        atol=5e-2, rtol=5e-2)

    print("KERNEL_OK")
</pallas_src>

<mosaic_0001>
module attributes {stable_mosaic.version = 11 : i64} {
  func.func @_feature_extractor_kernel(%arg0: memref<8x2x4xf32, #tpu.memory_space<vmem>>, %arg1: memref<4x128xf32, #tpu.memory_space<vmem>>, %arg2: memref<32x128xf32, #tpu.memory_space<vmem>>, %arg3: memref<1x128xf32, #tpu.memory_space<vmem>>, %arg4: memref<2x4xf32, #tpu.memory_space<vmem>>, %arg5: memref<2x36xf32, #tpu.memory_space<vmem>>) attributes {dimension_semantics = [], scalar_prefetch = 0 : i64, scratch_operands = 0 : i64, tpu.core_type = #tpu.core_type<tc>} {
    %c0 = arith.constant 0 : index
    %c0_0 = arith.constant 0 : index
    %c0_1 = arith.constant 0 : index
    %0 = vector.load %arg0[%c0, %c0_0, %c0_1] : memref<8x2x4xf32, #tpu.memory_space<vmem>>, vector<8x2x4xf32>
    %1 = vector.shape_cast %0 : vector<8x2x4xf32> to vector<16x4xf32>
    %2 = arith.truncf %1 : vector<16x4xf32> to vector<16x4xbf16>
    %c0_2 = arith.constant 0 : index
    %c0_3 = arith.constant 0 : index
    %3 = vector.load %arg1[%c0_2, %c0_3] : memref<4x128xf32, #tpu.memory_space<vmem>>, vector<4x128xf32>
    %4 = arith.truncf %3 : vector<4x128xf32> to vector<4x128xbf16>
    %cst = arith.constant dense<0.000000e+00> : vector<16x128xf32>
    %5 = tpu.matmul %2, %4, %cst {dimension_numbers = #tpu.dot_dimension_numbers<[1], [0], [0], [1], [0, 0, 1, 1], [], []>} : vector<16x4xbf16>, vector<4x128xbf16>, vector<16x128xf32> -> vector<16x128xf32>
    %c0_4 = arith.constant 0 : index
    %c0_5 = arith.constant 0 : index
    %6 = vector.load %arg3[%c0_4, %c0_5] : memref<1x128xf32, #tpu.memory_space<vmem>>, vector<1x128xf32>
    %7 = vector.broadcast %6 : vector<1x128xf32> to vector<16x128xf32>
    %8 = arith.addf %5, %7 : vector<16x128xf32>
    %c0_6 = arith.constant 0 : index
    %c0_7 = arith.constant 0 : index
    %9 = vector.load %arg2[%c0_6, %c0_7] : memref<32x128xf32, #tpu.memory_space<vmem>>, vector<32x128xf32>
    %10 = arith.truncf %9 : vector<32x128xf32> to vector<32x128xbf16>
    %11 = tpu.iota {dimensions = array<i32: 1>} : vector<2x128xi32>
    %c64_i32 = arith.constant 64 : i32
    %12 = vector.broadcast %c64_i32 : i32 to vector<2x128xi32>
    %13 = arith.cmpi sge, %11, %12 : vector<2x128xi32>
    %c96_i32 = arith.constant 96 : i32
    %14 = vector.broadcast %c96_i32 : i32 to vector<2x128xi32>
    %15 = arith.cmpi slt, %11, %14 : vector<2x128xi32>
    %16 = arith.andi %13, %15 : vector<2x128xi1>
    %cst_8 = arith.constant 0.000000e+00 : f32
    %17 = vector.broadcast %cst_8 : f32 to vector<2x32xf32>
    %cst_9 = arith.constant 0.000000e+00 : f32
    %18 = vector.broadcast %cst_9 : f32 to vector<2x32xf32>
    %19 = vector.extract_strided_slice %8 {offsets = [0, 0], sizes = [2, 128], strides = [1, 1]} : vector<16x128xf32> to vector<2x128xf32>
    %20 = arith.truncf %17 : vector<2x32xf32> to vector<2x32xbf16>
    %cst_10 = arith.constant dense<0.000000e+00> : vector<2x128xf32>
    %21 = tpu.matmul %20, %10, %cst_10 {dimension_numbers = #tpu.dot_dimension_numbers<[1], [0], [0], [1], [0, 0, 1, 1], [], []>} : vector<2x32xbf16>, vector<32x128xbf16>, vector<2x128xf32> -> vector<2x128xf32>
    %22 = arith.addf %19, %21 : vector<2x128xf32>
    %cst_11 = arith.constant 5.000000e-01 : f32
    %23 = vector.broadcast %cst_11 : f32 to vector<2x128xf32>
    %24 = arith.mulf %22, %23 : vector<2x128xf32>
    %25 = arith.select %16, %22, %24 : vector<2x128xi1>, vector<2x128xf32>
    %26 = math.tanh %25 : vector<2x128xf32>
    %cst_12 = arith.constant 5.000000e-01 : f32
    %27 = vector.broadcast %cst_12 : f32 to vector<2x128xf32>
    %28 = arith.mulf %26, %27 : vector<2x128xf32>
    %cst_13 = arith.constant 5.000000e-01 : f32
    %29 = vector.broadcast %cst_13 : f32 to vector<2x128xf32>
    %30 = arith.addf %28, %29 : vector<2x128xf32>
    %31 = arith.select %16, %26, %30 : vector<2x128xi1>, vector<2x128xf32>
    %32 = vector.extract_strided_slice %31 {offsets = [0, 0], sizes = [2, 32], strides = [1, 1]} : vector<2x128xf32> to vector<2x32xf32>
    %33 = vector.extract_strided_slice %31 {offsets = [0, 32], sizes = [2, 32], strides = [1, 1]} : vector<2x128xf32> to vector<2x32xf32>
    %34 = vector.extract_strided_slice %31 {offsets = [0, 64], sizes = [2, 32], strides = [1, 1]} : vector<2x128xf32> to vector<2x32xf32>
    %35 = vector.extract_strided_slice %31 {offsets = [0, 96], sizes = [2, 32], strides = [1, 1]} : vector<2x128xf32> to vector<2x32xf32>
    %36 = arith.mulf %33, %18 : vector<2x32xf32>
    %37 = arith.mulf %32, %34 : vector<2x32xf32>
    %38 = arith.addf %36, %37 : vector<2x32xf32>
    %39 = math.tanh %38 : vector<2x32xf32>
    %40 = arith.mulf %35, %39 : vector<2x32xf32>
    %41 = vector.extract_strided_slice %8 {offsets = [2, 0], sizes = [2, 128], strides = [1, 1]} : vector<16x128xf32> to vector<2x128xf32>
    %42 = arith.truncf %40 : vector<2x32xf32> to vector<2x32xbf16>
    %cst_14 = arith.constant dense<0.000000e+00> : vector<2x128xf32>
    %43 = tpu.matmul %42, %10, %cst_14 {dimension_numbers = #tpu.dot_dimension_numbers<[1], [0], [0], [1], [0, 0, 1, 1], [], []>} : vector<2x32xbf16>, vector<32x128xbf16>, vector<2x128xf32> -> vector<2x128xf32>
    %44 = arith.addf %41, %43 : vector<2x128xf32>
    %cst_15 = arith.constant 5.000000e-01 : f32
    %45 = vector.broadcast %cst_15 : f32 to vector<2x128xf32>
    %46 = arith.mulf %44, %45 : vector<2x128xf32>
    %47 = arith.select %16, %44, %46 : vector<2x128xi1>, vector<2x128xf32>
    %48 = math.tanh %47 : vector<2x128xf32>
    %cst_16 = arith.constant 5.000000e-01 : f32
    %49 = vector.broadcast %cst_16 : f32 to vector<2x128xf32>
    %50 = arith.mulf %48, %49 : vector<2x128xf32>
    %cst_17 = arith.constant 5.000000e-01 : f32
    %51 = vector.broadcast %cst_17 : f32 to vector<2x128xf32>
    %52 = arith.addf %50, %51 : vector<2x128xf32>
    %53 = arith.select %16, %48, %52 : vector<2x128xi1>, vector<2x128xf32>
    %54 = vector.extract_strided_slice %53 {offsets = [0, 0], sizes = [2, 32], strides = [1, 1]} : vector<2x128xf32> to vector<2x32xf32>
    %55 = vector.extract_strided_slice %53 {offsets = [0, 32], sizes = [2, 32], strides = [1, 1]} : vector<2x128xf32> to vector<2x32xf32>
    %56 = vector.extract_strided_slice %53 {offsets = [0, 64], sizes = [2, 32], strides = [1, 1]} : vector<2x128xf32> to vector<2x32xf32>
    %57 = vector.extract_strided_slice %53 {offsets = [0, 96], sizes = [2, 32], strides = [1, 1]} : vector<2x128xf32> to vector<2x32xf32>
    %58 = arith.mulf %55, %38 : vector<2x32xf32>
    %59 = arith.mulf %54, %56 : vector<2x32xf32>
    %60 = arith.addf %58, %59 : vector<2x32xf32>
    %61 = math.tanh %60 : vector<2x32xf32>
    %62 = arith.mulf %57, %61 : vector<2x32xf32>
    %63 = vector.extract_strided_slice %8 {offsets = [4, 0], sizes = [2, 128], strides = [1, 1]} : vector<16x128xf32> to vector<2x128xf32>
    %64 = arith.truncf %62 : vector<2x32xf32> to vector<2x32xbf16>
    %cst_18 = arith.constant dense<0.000000e+00> : vector<2x128xf32>
    %65 = tpu.matmul %64, %10, %cst_18 {dimension_numbers = #tpu.dot_dimension_numbers<[1], [0], [0], [1], [0, 0, 1, 1], [], []>} : vector<2x32xbf16>, vector<32x128xbf16>, vector<2x128xf32> -> vector<2x128xf32>
    %66 = arith.addf %63, %65 : vector<2x128xf32>
    %cst_19 = arith.constant 5.000000e-01 : f32
    %67 = vector.broadcast %cst_19 : f32 to vector<2x128xf32>
    %68 = arith.mulf %66, %67 : vector<2x128xf32>
    %69 = arith.select %16, %66, %68 : vector<2x128xi1>, vector<2x128xf32>
    %70 = math.tanh %69 : vector<2x128xf32>
    %cst_20 = arith.constant 5.000000e-01 : f32
    %71 = vector.broadcast %cst_20 : f32 to vector<2x128xf32>
    %72 = arith.mulf %70, %71 : vector<2x128xf32>
    %cst_21 = arith.constant 5.000000e-01 : f32
    %73 = vector.broadcast %cst_21 : f32 to vector<2x128xf32>
    %74 = arith.addf %72, %73 : vector<2x128xf32>
    %75 = arith.select %16, %70, %74 : vector<2x128xi1>, vector<2x128xf32>
    %76 = vector.extract_strided_slice %75 {offsets = [0, 0], sizes = [2, 32], strides = [1, 1]} : vector<2x128xf32> to vector<2x32xf32>
    %77 = vector.extract_strided_slice %75 {offsets = [0, 32], sizes = [2, 32], strides = [1, 1]} : vector<2x128xf32> to vector<2x32xf32>
    %78 = vector.extract_strided_slice %75 {offsets = [0, 64], sizes = [2, 32], strides = [1, 1]} : vector<2x128xf32> to vector<2x32xf32>
    %79 = vector.extract_strided_slice %75 {offsets = [0, 96], sizes = [2, 32], strides = [1, 1]} : vector<2x128xf32> to vector<2x32xf32>
    %80 = arith.mulf %77, %60 : vector<2x32xf32>
    %81 = arith.mulf %76, %78 : vector<2x32xf32>
    %82 = arith.addf %80, %81 : vector<2x32xf32>
    %83 = math.tanh %82 : vector<2x32xf32>
    %84 = arith.mulf %79, %83 : vector<2x32xf32>
    %85 = vector.extract_strided_slice %8 {offsets = [6, 0], sizes = [2, 128], strides = [1, 1]} : vector<16x128xf32> to vector<2x128xf32>
    %86 = arith.truncf %84 : vector<2x32xf32> to vector<2x32xbf16>
    %cst_22 = arith.constant dense<0.000000e+00> : vector<2x128xf32>
    %87 = tpu.matmul %86, %10, %cst_22 {dimension_numbers = #tpu.dot_dimension_numbers<[1], [0], [0], [1], [0, 0, 1, 1], [], []>} : vector<2x32xbf16>, vector<32x128xbf16>, vector<2x128xf32> -> vector<2x128xf32>
    %88 = arith.addf %85, %87 : vector<2x128xf32>
    %cst_23 = arith.constant 5.000000e-01 : f32
    %89 = vector.broadcast %cst_23 : f32 to vector<2x128xf32>
    %90 = arith.mulf %88, %89 : vector<2x128xf32>
    %91 = arith.select %16, %88, %90 : vector<2x128xi1>, vector<2x128xf32>
    %92 = math.tanh %91 : vector<2x128xf32>
    %cst_24 = arith.constant 5.000000e-01 : f32
    %93 = vector.broadcast %cst_24 : f32 to vector<2x128xf32>
    %94 = arith.mulf %92, %93 : vector<2x128xf32>
    %cst_25 = arith.constant 5.000000e-01 : f32
    %95 = vector.broadcast %cst_25 : f32 to vector<2x128xf32>
    %96 = arith.addf %94, %95 : vector<2x128xf32>
    %97 = arith.select %16, %92, %96 : vector<2x128xi1>, vector<2x128xf32>
    %98 = vector.extract_strided_slice %97 {offsets = [0, 0], sizes = [2, 32], strides = [1, 1]} : vector<2x128xf32> to vector<2x32xf32>
    %99 = vector.extract_strided_slice %97 {offsets = [0, 32], sizes = [2, 32], strides = [1, 1]} : vector<2x128xf32> to vector<2x32xf32>
    %100 = vector.extract_strided_slice %97 {offsets = [0, 64], sizes = [2, 32], strides = [1, 1]} : vector<2x128xf32> to vector<2x32xf32>
    %101 = vector.extract_strided_slice %97 {offsets = [0, 96], sizes = [2, 32], strides = [1, 1]} : vector<2x128xf32> to vector<2x32xf32>
    %102 = arith.mulf %99, %82 : vector<2x32xf32>
    %103 = arith.mulf %98, %100 : vector<2x32xf32>
    %104 = arith.addf %102, %103 : vector<2x32xf32>
    %105 = math.tanh %104 : vector<2x32xf32>
    %106 = arith.mulf %101, %105 : vector<2x32xf32>
    %107 = vector.extract_strided_slice %8 {offsets = [8, 0], sizes = [2, 128], strides = [1, 1]} : vector<16x128xf32> to vector<2x128xf32>
    %108 = arith.truncf %106 : vector<2x32xf32> to vector<2x32xbf16>
    %cst_26 = arith.constant dense<0.000000e+00> : vector<2x128xf32>
    %109 = tpu.matmul %108, %10, %cst_26 {dimension_numbers = #tpu.dot_dimension_numbers<[1], [0], [0], [1], [0, 0, 1, 1], [], []>} : vector<2x32xbf16>, vector<32x128xbf16>, vector<2x128xf32> -> vector<2x128xf32>
    %110 = arith.addf %107, %109 : vector<2x128xf32>
    %cst_27 = arith.constant 5.000000e-01 : f32
    %111 = vector.broadcast %cst_27 : f32 to vector<2x128xf32>
    %112 = arith.mulf %110, %111 : vector<2x128xf32>
    %113 = arith.select %16, %110, %112 : vector<2x128xi1>, vector<2x128xf32>
    %114 = math.tanh %113 : vector<2x128xf32>
    %cst_28 = arith.constant 5.000000e-01 : f32
    %115 = vector.broadcast %cst_28 : f32 to vector<2x128xf32>
    %116 = arith.mulf %114, %115 : vector<2x128xf32>
    %cst_29 = arith.constant 5.000000e-01 : f32
    %117 = vector.broadcast %cst_29 : f32 to vector<2x128xf32>
    %118 = arith.addf %116, %117 : vector<2x128xf32>
    %119 = arith.select %16, %114, %118 : vector<2x128xi1>, vector<2x128xf32>
    %120 = vector.extract_strided_slice %119 {offsets = [0, 0], sizes = [2, 32], strides = [1, 1]} : vector<2x128xf32> to vector<2x32xf32>
    %121 = vector.extract_strided_slice %119 {offsets = [0, 32], sizes = [2, 32], strides = [1, 1]} : vector<2x128xf32> to vector<2x32xf32>
    %122 = vector.extract_strided_slice %119 {offsets = [0, 64], sizes = [2, 32], strides = [1, 1]} : vector<2x128xf32> to vector<2x32xf32>
    %123 = vector.extract_strided_slice %119 {offsets = [0, 96], sizes = [2, 32], strides = [1, 1]} : vector<2x128xf32> to vector<2x32xf32>
    %124 = arith.mulf %121, %104 : vector<2x32xf32>
    %125 = arith.mulf %120, %122 : vector<2x32xf32>
    %126 = arith.addf %124, %125 : vector<2x32xf32>
    %127 = math.tanh %126 : vector<2x32xf32>
    %128 = arith.mulf %123, %127 : vector<2x32xf32>
    %129 = vector.extract_strided_slice %8 {offsets = [10, 0], sizes = [2, 128], strides = [1, 1]} : vector<16x128xf32> to vector<2x128xf32>
    %130 = arith.truncf %128 : vector<2x32xf32> to vector<2x32xbf16>
    %cst_30 = arith.constant dense<0.000000e+00> : vector<2x128xf32>
    %131 = tpu.matmul %130, %10, %cst_30 {dimension_numbers = #tpu.dot_dimension_numbers<[1], [0], [0], [1], [0, 0, 1, 1], [], []>} : vector<2x32xbf16>, vector<32x128xbf16>, vector<2x128xf32> -> vector<2x128xf32>
    %132 = arith.addf %129, %131 : vector<2x128xf32>
    %cst_31 = arith.constant 5.000000e-01 : f32
    %133 = vector.broadcast %cst_31 : f32 to vector<2x128xf32>
    %134 = arith.mulf %132, %133 : vector<2x128xf32>
    %135 = arith.select %16, %132, %134 : vector<2x128xi1>, vector<2x128xf32>
    %136 = math.tanh %135 : vector<2x128xf32>
    %cst_32 = arith.constant 5.000000e-01 : f32
    %137 = vector.broadcast %cst_32 : f32 to vector<2x128xf32>
    %138 = arith.mulf %136, %137 : vector<2x128xf32>
    %cst_33 = arith.constant 5.000000e-01 : f32
    %139 = vector.broadcast %cst_33 : f32 to vector<2x128xf32>
    %140 = arith.addf %138, %139 : vector<2x128xf32>
    %141 = arith.select %16, %136, %140 : vector<2x128xi1>, vector<2x128xf32>
    %142 = vector.extract_strided_slice %141 {offsets = [0, 0], sizes = [2, 32], strides = [1, 1]} : vector<2x128xf32> to vector<2x32xf32>
    %143 = vector.extract_strided_slice %141 {offsets = [0, 32], sizes = [2, 32], strides = [1, 1]} : vector<2x128xf32> to vector<2x32xf32>
    %144 = vector.extract_strided_slice %141 {offsets = [0, 64], sizes = [2, 32], strides = [1, 1]} : vector<2x128xf32> to vector<2x32xf32>
    %145 = vector.extract_strided_slice %141 {offsets = [0, 96], sizes = [2, 32], strides = [1, 1]} : vector<2x128xf32> to vector<2x32xf32>
    %146 = arith.mulf %143, %126 : vector<2x32xf32>
    %147 = arith.mulf %142, %144 : vector<2x32xf32>
    %148 = arith.addf %146, %147 : vector<2x32xf32>
    %149 = math.tanh %148 : vector<2x32xf32>
    %150 = arith.mulf %145, %149 : vector<2x32xf32>
    %151 = vector.extract_strided_slice %8 {offsets = [12, 0], sizes = [2, 128], strides = [1, 1]} : vector<16x128xf32> to vector<2x128xf32>
    %152 = arith.truncf %150 : vector<2x32xf32> to vector<2x32xbf16>
    %cst_34 = arith.constant dense<0.000000e+00> : vector<2x128xf32>
    %153 = tpu.matmul %152, %10, %cst_34 {dimension_numbers = #tpu.dot_dimension_numbers<[1], [0], [0], [1], [0, 0, 1, 1], [], []>} : vector<2x32xbf16>, vector<32x128xbf16>, vector<2x128xf32> -> vector<2x128xf32>
    %154 = arith.addf %151, %153 : vector<2x128xf32>
    %cst_35 = arith.constant 5.000000e-01 : f32
    %155 = vector.broadcast %cst_35 : f32 to vector<2x128xf32>
    %156 = arith.mulf %154, %155 : vector<2x128xf32>
    %157 = arith.select %16, %154, %156 : vector<2x128xi1>, vector<2x128xf32>
    %158 = math.tanh %157 : vector<2x128xf32>
    %cst_36 = arith.constant 5.000000e-01 : f32
    %159 = vector.broadcast %cst_36 : f32 to vector<2x128xf32>
    %160 = arith.mulf %158, %159 : vector<2x128xf32>
    %cst_37 = arith.constant 5.000000e-01 : f32
    %161 = vector.broadcast %cst_37 : f32 to vector<2x128xf32>
    %162 = arith.addf %160, %161 : vector<2x128xf32>
    %163 = arith.select %16, %158, %162 : vector<2x128xi1>, vector<2x128xf32>
    %164 = vector.extract_strided_slice %163 {offsets = [0, 0], sizes = [2, 32], strides = [1, 1]} : vector<2x128xf32> to vector<2x32xf32>
    %165 = vector.extract_strided_slice %163 {offsets = [0, 32], sizes = [2, 32], strides = [1, 1]} : vector<2x128xf32> to vector<2x32xf32>
    %166 = vector.extract_strided_slice %163 {offsets = [0, 64], sizes = [2, 32], strides = [1, 1]} : vector<2x128xf32> to vector<2x32xf32>
    %167 = vector.extract_strided_slice %163 {offsets = [0, 96], sizes = [2, 32], strides = [1, 1]} : vector<2x128xf32> to vector<2x32xf32>
    %168 = arith.mulf %165, %148 : vector<2x32xf32>
    %169 = arith.mulf %164, %166 : vector<2x32xf32>
    %170 = arith.addf %168, %169 : vector<2x32xf32>
    %171 = math.tanh %170 : vector<2x32xf32>
    %172 = arith.mulf %167, %171 : vector<2x32xf32>
    %173 = vector.extract_strided_slice %8 {offsets = [14, 0], sizes = [2, 128], strides = [1, 1]} : vector<16x128xf32> to vector<2x128xf32>
    %174 = arith.truncf %172 : vector<2x32xf32> to vector<2x32xbf16>
    %cst_38 = arith.constant dense<0.000000e+00> : vector<2x128xf32>
    %175 = tpu.matmul %174, %10, %cst_38 {dimension_numbers = #tpu.dot_dimension_numbers<[1], [0], [0], [1], [0, 0, 1, 1], [], []>} : vector<2x32xbf16>, vector<32x128xbf16>, vector<2x128xf32> -> vector<2x128xf32>
    %176 = arith.addf %173, %175 : vector<2x128xf32>
    %cst_39 = arith.constant 5.000000e-01 : f32
    %177 = vector.broadcast %cst_39 : f32 to vector<2x128xf32>
    %178 = arith.mulf %176, %177 : vector<2x128xf32>
    %179 = arith.select %16, %176, %178 : vector<2x128xi1>, vector<2x128xf32>
    %180 = math.tanh %179 : vector<2x128xf32>
    %cst_40 = arith.constant 5.000000e-01 : f32
    %181 = vector.broadcast %cst_40 : f32 to vector<2x128xf32>
    %182 = arith.mulf %180, %181 : vector<2x128xf32>
    %cst_41 = arith.constant 5.000000e-01 : f32
    %183 = vector.broadcast %cst_41 : f32 to vector<2x128xf32>
    %184 = arith.addf %182, %183 : vector<2x128xf32>
    %185 = arith.select %16, %180, %184 : vector<2x128xi1>, vector<2x128xf32>
    %186 = vector.extract_strided_slice %185 {offsets = [0, 0], sizes = [2, 32], strides = [1, 1]} : vector<2x128xf32> to vector<2x32xf32>
    %187 = vector.extract_strided_slice %185 {offsets = [0, 32], sizes = [2, 32], strides = [1, 1]} : vector<2x128xf32> to vector<2x32xf32>
    %188 = vector.extract_strided_slice %185 {offsets = [0, 64], sizes = [2, 32], strides = [1, 1]} : vector<2x128xf32> to vector<2x32xf32>
    %189 = vector.extract_strided_slice %185 {offsets = [0, 96], sizes = [2, 32], strides = [1, 1]} : vector<2x128xf32> to vector<2x32xf32>
    %190 = arith.mulf %187, %170 : vector<2x32xf32>
    %191 = arith.mulf %186, %188 : vector<2x32xf32>
    %192 = arith.addf %190, %191 : vector<2x32xf32>
    %193 = math.tanh %192 : vector<2x32xf32>
    %194 = arith.mulf %189, %193 : vector<2x32xf32>
    %c0_42 = arith.constant 0 : index
    %c0_43 = arith.constant 0 : index
    %195 = vector.load %arg4[%c0_42, %c0_43] : memref<2x4xf32, #tpu.memory_space<vmem>>, vector<2x4xf32>
    %196 = tpu.concatenate %194, %195 in 1 : vector<2x32xf32>, vector<2x4xf32> -> vector<2x36xf32>
    %c0_44 = arith.constant 0 : index
    %c0_45 = arith.constant 0 : index
    %197 = vector.load %arg5[%c0_44, %c0_45] : memref<2x36xf32, #tpu.memory_space<vmem>>, vector<2x36xf32>
    tpu.vector_store %arg5[%c0_44, %c0_45], %196 {strides = array<i32>} : memref<2x36xf32, #tpu.memory_space<vmem>>, vector<2x36xf32>,
    return
  }
}

</mosaic_0001>

<bundles_post_ra>
// kernel: tpu_custom_call.1
= control target key start
LH: loop header
LB: loop body
LE: loop exit
PB: predicated region body
PF: predicated region fallthrough
CT: control target
= control target key end

     0   :  { %10 = vsyncpa [#allocation3], 0  ;;  %s805_s0 = inlined_call_operand.vmem [shape: f32[8,2,4], index: 0, kind: input, shape index: {}]   ;;  %s806_s1 = inlined_call_operand.vmem [shape: f32[4,128], index: 1, kind: input, shape index: {}]   ;;  %s807_s2 = inlined_call_operand.hbm [shape: f32[32,128], index: 2, kind: input, shape index: {}]   ;;  %s808_s3 = inlined_call_operand.vmem [shape: f32[1,128], index: 3, kind: input, shape index: {}]   ;;  %s809_s4 = inlined_call_operand.vmem [shape: f32[2,4], index: 4, kind: input, shape index: {}]   ;;  %s810_s5 = inlined_call_operand.hbm [shape: f32[2,36], index: 5, kind: output, shape index: {}]  }
   0x1   :  { %11 = vsyncpa [#allocation4], 0  ;;  %s20_s20 = sshll.u32 %s807_s2, 4  ;;  %s636_s21 = smov [#allocation2]   ;;  %s21_s20 = int_to_ptr.hbm [resolvable:$true] %s20_s20 }
   0x2   :  { %s22_s22 = sshll.u32 %s636_s21, 4  ;;  %s637_s23 = smov 128   ;;  %s23_s22 = int_to_ptr.vmem [resolvable:$true] %s22_s22 }
   0x3   :  { %s638_s24 = smov 8  }
   0x4   :  { %28 = dma.hbm_to_vmem [thread:$0]  %s21_s20, 512, %s23_s22, [#allocation3], %s637_s23, %s637_s23, %s638_s24  }
   0x5   :  { %632 = dma.done.wait [#allocation3], 512  }
   0x6   :  { %633 = vsyncadd [#allocation3], 4294966784  ;;  %v104_v0 = vld [vmem:[#allocation2 + $0x10] sm:$0xff]  ;;  %v105_v1 = vld [vmem:[#allocation2 + $0x18] sm:$0xff]  ;;  %vm84_vm0 = vcmask 1041408   ;;  %v639_v17 = vmov 0   ;;  %v108_v22 = vlaneseq }
   0x7   :  { %v102_v2 = vld [vmem:[#allocation2] sm:$0xff]  ;;  %v107_v3 = vpack.c.bf16 %v105_v1, %v104_v0  ;;  %v103_v4 = vld [vmem:[#allocation2 + $0x8] sm:$0xff]  ;;  %v74_v5 = vld [vmem:[%s806_s1] sm:$0xf]  ;;  %vm80_vm1 = vcmask 31744   ;;  %s641_s17 = smov 32  }
   0x8   :  { %v38_v6 = vld [vmem:[%s805_s0] sm:$0x3]  ;;  %v75_v7 = vpack.c.bf16 %v74_v5, %v74_v5  ;;  %v39_v8 = vld [vmem:[%s805_s0 + $0x2] sm:$0x3]  ;;  %v106_v9 = vpack.c.bf16 %v103_v4, %v102_v2  ;;  %v40_v10 = vld [vmem:[%s805_s0 + $0x4] sm:$0x3] }
   0x9   :  { %123 = vmatpush.bf16.msra.mxu1 %v107_v3  ;;  %167 = vmatpush.bf16.msra.mxu2 %v107_v3  ;;  %v41_v12 = vld [vmem:[%s805_s0 + $0x6] sm:$0x3]  ;;  %54 = vst [vmem:[#allocation1] ss:$4 sm:$0xff] %v38_v6  ;;  %v42_v13 = vld [vmem:[%s805_s0 + $0x8] sm:$0x3] }
   0xa   :  { %v86_v11 = vsel %vm84_vm0, %v75_v7, 0  ;;  %218 = vmatpush.bf16.msra.mxu3 %v107_v3  ;;  %56 = vst [vmem:[#allocation1 + $0x1] ss:$4 sm:$0xff] %v39_v8  ;;  %v43_v14 = vld [vmem:[%s805_s0 + $0xa] sm:$0x3]  ;;  %v109_v24 = vand.u32 127, %v108_v22 }
   0xb   :  { %95 = vmatpush.bf16.msra.mxu0 %v86_v11  ;;  %58 = vst [vmem:[#allocation1 + $0x2] ss:$4 sm:$0xff] %v40_v10  ;;  %v44_v15 = vld [vmem:[%s805_s0 + $0xc] sm:$0x3]  ;;  %v45_v16 = vld [vmem:[%s805_s0 + $0xe] sm:$0x3] }
   0xc   :  { %60 = vst [vmem:[#allocation1 + $0x3] ss:$4 sm:$0xff] %v41_v12  ;;  %v706_v23 = vld [vmem:[%s808_s3] ss:$0 sm:$0xff]  ;;  %vm110_vm2 = vcmp.ge.s32.totalorder %v109_v24, 64  ;;  %vm111_vm3 = vcmp.lt.s32.totalorder %v109_v24, 96 }
   0xd   :  { %124 = vmatpush.bf16.msra.mxu1 %v106_v9  ;;  %168 = vmatpush.bf16.msra.mxu2 %v106_v9  ;;  %62 = vst [vmem:[#allocation1 + $0x20] ss:$4 sm:$0xff] %v42_v13  ;;  %vm712_vm4 = vmand %vm110_vm2, %vm111_vm3  ;;  %s640_s3 = smov 64   ;;  %vm113_vm5 = vcmask 261120   ;;  %s642_s20 = smov [#allocation5]   ;;  %vm517_vm6 = vcmask 293894  }
   0xe   :  { %219 = vmatpush.bf16.msra.mxu3 %v106_v9  ;;  %64 = vst [vmem:[#allocation1 + $0x21] ss:$4 sm:$0xff] %v43_v14  ;;  %s524_s21 = sshll.u32 %s642_s20, 4  ;;  %s526_s24 = sshll.u32 %s810_s5, 4  ;;  %s525_s21 = int_to_ptr.vmem [resolvable:$true] %s524_s21  ;;  %s527_s24 = int_to_ptr.hbm [resolvable:$true] %s526_s24 }
   0xf   :  { %269 = vmatpush.bf16.msrb.mxu0 %v107_v3  ;;  %66 = vst [vmem:[#allocation1 + $0x22] ss:$4 sm:$0xff] %v44_v15 }
  0x10   :  { %125 = vmatmul.bf16.vlgmr.msra.gmra.mxu1 %v639_v17  ;;  %68 = vst [vmem:[#allocation1 + $0x23] ss:$4 sm:$0xff] %v45_v16 }
  0x11   :  { %320 = vmatpush.bf16.msrb.mxu1 %v107_v3  ;;  %367 = vmatpush.bf16.msrb.mxu2 %v107_v3 }
  0x12   :  { %418 = vmatpush.bf16.msrb.mxu3 %v107_v3 }
  0x13   :  { %270 = vmatpush.bf16.msrb.mxu0 %v106_v9  ;;  %v69_v18 = vld.sshfl [vmem:[#allocation1] sm:$0xff pattern:$0x73625140] }
  0x15   :  { %321 = vmatpush.bf16.msrb.mxu1 %v106_v9  ;;  %368 = vmatpush.bf16.msrb.mxu2 %v106_v9 }
  0x16   :  { %419 = vmatpush.bf16.msrb.mxu3 %v106_v9 }
  0x17   :  { %v70_v19 = vld.sshfl [vmem:[#allocation1 + $0x20] sm:$0xff pattern:$0x73625140] }
  0x18   :  { %v73_v20 = vpack.c.bf16 %v70_v19, %v69_v18 }
  0x1a   :  { %536 = vmatmul.msk.bf16.vlgmr.msra.gmra.mxu0 %vm80_vm1, %v73_v20 }
  0x1b   :  { %469 = vmatpush.bf16.msra.mxu0 %v107_v3 }
  0x1f   :  { %470 = vmatpush.bf16.msra.mxu0 %v106_v9 }
  0x8d   :  { %v126_v21 = vpop.f32.mrf.mxu1 }
  0x95   :  { %v128_v25 = vpop.f32.mrf.mxu1 }
  0x97   :  { %v97_v26 = vpop.f32.mrf.mxu0 }
  0x98   :  { %v709_v27 = vadd.f32 %v706_v23, %v97_v26 }
  0x9a   :  { %v130_v28 = vadd.f32 %v126_v21, %v709_v27 }
  0x9c   :  { %v131_v30 = vmul.f32 0.5, %v130_v28 }
  0x9e   :  { %v132_v31 = vsel %vm712_vm4, %v130_v28, %v131_v30 }
  0x9f   :  { %552 = vtanh.f32 %v132_v31  ;;  %v99_v28 = vpop.f32.mrf.mxu0 }
  0xa5   :  { %v553_v32 = vpop.eup %552 }
  0xa6   :  { %v134_v33 = vmul.f32 0.5, %v553_v32 }
  0xa8   :  { %v135_v34 = vadd.f32 0.5, %v134_v33 }
  0xaa   :  { %v136_v35 = vsel %vm712_vm4, %v553_v32, %v135_v34 }
  0xab   :  { %139 = vrot.lane.b32.xlu0 %v136_v35, %s640_s3  ;;  %v137_v38 = vmul.f32 0.0, %v136_v35 }
 0x11d   :  { %v140_v36 = vpop.permute.xlu0 %139 }
 0x11e   :  { %v142_v37 = vmul.f32 %v140_v36, %v136_v35 }
 0x120   :  { %144 = vrot.lane.b32.xlu0 %v142_v37, %s641_s17 }
 0x192   :  { %v145_v39 = vpop.permute.xlu0 %144 }
 0x193   :  { %v147_v40 = vadd.f32 %v145_v39, %v137_v38 }
 0x195   :  { %554 = vtanh.f32 %v147_v40  ;;  %v185_v58 = vrot.slane %v147_v40, 6 }
 0x19b   :  { %v555_v41 = vpop.eup %554 }
 0x19c   :  { %150 = vrot.lane.b32.xlu1 %v555_v41, %s640_s3 }
 0x20e   :  { %v151_v42 = vpop.permute.xlu1 %150 }
 0x20f   :  { %v153_v43 = vmul.f32 %v151_v42, %v136_v35 }
 0x211   :  { %v154_v44 = vpack.c.bf16 %v153_v43, %v153_v43 }
 0x213   :  { %156 = vrot.lane.b32.xlu1 %v154_v44, %s641_s17 }
 0x285   :  { %v157_v45 = vpop.permute.xlu1 %156 }
 0x286   :  { %537 = vmatmul.msk.bf16.vlgmr.msra.gmra.mxu2 %vm113_vm5, %v157_v45 }
 0x309   :  { %v170_v46 = vpop.f32.mrf.mxu2 }
 0x30a   :  { %v175_v47 = vrot.slane %v170_v46, 6 }
 0x30c   :  { %v177_v48 = vadd.f32 %v175_v47, %v709_v27 }
 0x30e   :  { %v178_v49 = vmul.f32 0.5, %v177_v48 }
 0x310   :  { %v179_v50 = vsel %vm712_vm4, %v177_v48, %v178_v49 }
 0x311   :  { %556 = vtanh.f32 %v179_v50  ;;  %v172_v51 = vpop.f32.mrf.mxu2 }
 0x312   :  { %v756_v51 = vadd.f32 %v706_v23, %v99_v28 }
 0x317   :  { %v557_v52 = vpop.eup %556 }
 0x318   :  { %v181_v53 = vmul.f32 0.5, %v557_v52 }
 0x31a   :  { %v182_v54 = vadd.f32 0.5, %v181_v53 }
 0x31c   :  { %v183_v55 = vsel %vm712_vm4, %v557_v52, %v182_v54 }
 0x31d   :  { %189 = vrot.lane.b32.xlu2 %v183_v55, %s640_s3  ;;  %v187_v59 = vmul.f32 %v185_v58, %v183_v55 }
 0x377   :  { %v190_v56 = vpop.permute.xlu2 %189 }
 0x378   :  { %v192_v57 = vmul.f32 %v190_v56, %v183_v55 }
 0x37a   :  { %194 = vrot.lane.b32.xlu2 %v192_v57, %s641_s17 }
 0x3d4   :  { %v195_v60 = vpop.permute.xlu2 %194 }
 0x3d5   :  { %v197_v61 = vadd.f32 %v195_v60, %v187_v59 }
 0x3d7   :  { %558 = vtanh.f32 %v197_v61  ;;  %v236_v16 = vrot.slane %v197_v61, 6 }
 0x3dd   :  { %v559_v62 = vpop.eup %558 }
 0x3de   :  { %200 = vrot.lane.b32.xlu0 %v559_v62, %s640_s3 }
 0x450   :  { %v201_v63 = vpop.permute.xlu0 %200 }
 0x451   :  { %v203_v0 = vmul.f32 %v201_v63, %v183_v55 }
 0x453   :  { %v204_v1 = vpack.c.bf16 %v203_v0, %v203_v0 }
 0x455   :  { %v206_v2 = vrot.slane %v204_v1, 1 }
 0x457   :  { %207 = vrot.lane.b32.xlu1 %v206_v2, %s641_s17 }
 0x4c9   :  { %v208_v3 = vpop.permute.xlu1 %207 }
 0x4ca   :  { %538 = vmatmul.msk.bf16.vlgmr.msra.gmra.mxu3 %vm113_vm5, %v208_v3 }
 0x54d   :  { %v221_v4 = vpop.f32.mrf.mxu3 }
 0x54e   :  { %v226_v5 = vrot.slane %v221_v4, 4 }
 0x550   :  { %v228_v6 = vadd.f32 %v226_v5, %v709_v27 }
 0x552   :  { %v229_v7 = vmul.f32 0.5, %v228_v6 }
 0x554   :  { %v230_v8 = vsel %vm712_vm4, %v228_v6, %v229_v7 }
 0x555   :  { %560 = vtanh.f32 %v230_v8  ;;  %v223_v9 = vpop.f32.mrf.mxu3 }
 0x55b   :  { %v561_v10 = vpop.eup %560 }
 0x55c   :  { %v232_v11 = vmul.f32 0.5, %v561_v10 }
 0x55e   :  { %v233_v12 = vadd.f32 0.5, %v232_v11 }
 0x560   :  { %v234_v13 = vsel %vm712_vm4, %v561_v10, %v233_v12 }
 0x561   :  { %240 = vrot.lane.b32.xlu2 %v234_v13, %s640_s3  ;;  %v238_v17 = vmul.f32 %v236_v16, %v234_v13 }
 0x5bb   :  { %v241_v14 = vpop.permute.xlu2 %240 }
 0x5bc   :  { %v243_v15 = vmul.f32 %v241_v14, %v234_v13 }
 0x5be   :  { %245 = vrot.lane.b32.xlu0 %v243_v15, %s641_s17 }
 0x630   :  { %v246_v18 = vpop.permute.xlu0 %245 }
 0x631   :  { %v248_v19 = vadd.f32 %v246_v18, %v238_v17 }
 0x633   :  { %562 = vtanh.f32 %v248_v19  ;;  %v287_v42 = vrot.slane %v248_v19, 6 }
 0x639   :  { %v563_v20 = vpop.eup %562 }
 0x63a   :  { %251 = vrot.lane.b32.xlu1 %v563_v20, %s640_s3 }
 0x6ac   :  { %v252_v21 = vpop.permute.xlu1 %251 }
 0x6ad   :  { %v254_v22 = vmul.f32 %v252_v21, %v234_v13 }
 0x6af   :  { %v255_v24 = vpack.c.bf16 %v254_v22, %v254_v22 }
 0x6b1   :  { %v257_v25 = vrot.slane %v255_v24, 2 }
 0x6b3   :  { %258 = vrot.lane.b32.xlu2 %v257_v25, %s641_s17 }
 0x70d   :  { %v259_v26 = vpop.permute.xlu2 %258 }
 0x70e   :  { %539 = vmatmul.msk.bf16.vlgmr.msrb.gmra.mxu0 %vm113_vm5, %v259_v26 }
 0x78b   :  { %v272_v30 = vpop.f32.mrf.mxu0 }
 0x78c   :  { %v277_v31 = vrot.slane %v272_v30, 2 }
 0x78e   :  { %v279_v32 = vadd.f32 %v277_v31, %v709_v27 }
 0x790   :  { %v280_v33 = vmul.f32 0.5, %v279_v32 }
 0x792   :  { %v281_v34 = vsel %vm712_vm4, %v279_v32, %v280_v33 }
 0x793   :  { %564 = vtanh.f32 %v281_v34  ;;  %v274_v35 = vpop.f32.mrf.mxu0 }
 0x799   :  { %v565_v36 = vpop.eup %564 }
 0x79a   :  { %v283_v37 = vmul.f32 0.5, %v565_v36 }
 0x79c   :  { %v284_v38 = vadd.f32 0.5, %v283_v37 }
 0x79e   :  { %v285_v39 = vsel %vm712_vm4, %v565_v36, %v284_v38 }
 0x79f   :  { %291 = vrot.lane.b32.xlu0 %v285_v39, %s640_s3  ;;  %v289_v27 = vmul.f32 %v287_v42, %v285_v39 }
 0x811   :  { %v292_v40 = vpop.permute.xlu0 %291 }
 0x812   :  { %v294_v41 = vmul.f32 %v292_v40, %v285_v39 }
 0x814   :  { %296 = vrot.lane.b32.xlu1 %v294_v41, %s641_s17 }
 0x886   :  { %v297_v43 = vpop.permute.xlu1 %296 }
 0x887   :  { %v299_v44 = vadd.f32 %v297_v43, %v289_v27 }
 0x889   :  { %566 = vtanh.f32 %v299_v44  ;;  %v335_v62 = vrot.slane %v299_v44, 6 }
 0x88f   :  { %v567_v45 = vpop.eup %566 }
 0x890   :  { %302 = vrot.lane.b32.xlu2 %v567_v45, %s640_s3 }
 0x8ea   :  { %v303_v46 = vpop.permute.xlu2 %302 }
 0x8eb   :  { %v305_v47 = vmul.f32 %v303_v46, %v285_v39 }
 0x8ed   :  { %v306_v48 = vpack.c.bf16 %v305_v47, %v305_v47 }
 0x8ef   :  { %v308_v49 = vrot.slane %v306_v48, 3 }
 0x8f1   :  { %309 = vrot.lane.b32.xlu0 %v308_v49, %s641_s17 }
 0x963   :  { %v310_v50 = vpop.permute.xlu0 %309 }
 0x964   :  { %540 = vmatmul.msk.bf16.vlgmr.msrb.gmra.mxu1 %vm113_vm5, %v310_v50 }
 0x9e1   :  { %v323_v52 = vpop.f32.mrf.mxu1 }
 0x9e2   :  { %v327_v53 = vadd.f32 %v323_v52, %v756_v51 }
 0x9e4   :  { %v328_v54 = vmul.f32 0.5, %v327_v53 }
 0x9e6   :  { %v329_v55 = vsel %vm712_vm4, %v327_v53, %v328_v54 }
 0x9e7   :  { %568 = vtanh.f32 %v329_v55 }
 0x9e9   :  { %v325_v56 = vpop.f32.mrf.mxu1 }
 0x9ed   :  { %v569_v57 = vpop.eup %568 }
 0x9ee   :  { %v331_v58 = vmul.f32 0.5, %v569_v57 }
 0x9f0   :  { %v332_v59 = vadd.f32 0.5, %v331_v58 }
 0x9f2   :  { %v333_v60 = vsel %vm712_vm4, %v569_v57, %v332_v59 }
 0x9f3   :  { %339 = vrot.lane.b32.xlu1 %v333_v60, %s640_s3  ;;  %v337_v63 = vmul.f32 %v335_v62, %v333_v60 }
 0xa65   :  { %v340_v61 = vpop.permute.xlu1 %339 }
 0xa66   :  { %v342_v23 = vmul.f32 %v340_v61, %v333_v60 }
 0xa68   :  { %344 = vrot.lane.b32.xlu2 %v342_v23, %s641_s17 }
 0xac2   :  { %v345_v0 = vpop.permute.xlu2 %344 }
 0xac3   :  { %v347_v1 = vadd.f32 %v345_v0, %v337_v63 }
 0xac5   :  { %570 = vtanh.f32 %v347_v1  ;;  %v385_v19 = vrot.slane %v347_v1, 6 }
 0xacb   :  { %v571_v2 = vpop.eup %570 }
 0xacc   :  { %350 = vrot.lane.b32.xlu0 %v571_v2, %s640_s3 }
 0xb3e   :  { %v351_v3 = vpop.permute.xlu0 %350 }
 0xb3f   :  { %v353_v4 = vmul.f32 %v351_v3, %v333_v60 }
 0xb41   :  { %v354_v5 = vpack.c.bf16 %v353_v4, %v353_v4 }
 0xb43   :  { %356 = vrot.lane.b32.xlu1 %v354_v5, %s641_s17  ;;  %v506_v5 = vld [vmem:[%s809_s4] sm:$0x3] }
 0xb44   :  { %v512_v29 = vrot.slane %v506_v5, 2 }
 0xbb5   :  { %v357_v6 = vpop.permute.xlu1 %356 }
 0xbb6   :  { %541 = vmatmul.msk.bf16.vlgmr.msrb.gmra.mxu2 %vm113_vm5, %v357_v6 }
 0xc39   :  { %v370_v7 = vpop.f32.mrf.mxu2 }
 0xc3a   :  { %v375_v8 = vrot.slane %v370_v7, 6 }
 0xc3c   :  { %v377_v9 = vadd.f32 %v375_v8, %v756_v51 }
 0xc3e   :  { %v378_v10 = vmul.f32 0.5, %v377_v9 }
 0xc40   :  { %v379_v11 = vsel %vm712_vm4, %v377_v9, %v378_v10 }
 0xc41   :  { %572 = vtanh.f32 %v379_v11  ;;  %v372_v12 = vpop.f32.mrf.mxu2 }
 0xc47   :  { %v573_v13 = vpop.eup %572 }
 0xc48   :  { %v381_v14 = vmul.f32 0.5, %v573_v13 }
 0xc4a   :  { %v382_v15 = vadd.f32 0.5, %v381_v14 }
 0xc4c   :  { %v383_v16 = vsel %vm712_vm4, %v573_v13, %v382_v15 }
 0xc4d   :  { %389 = vrot.lane.b32.xlu2 %v383_v16, %s640_s3  ;;  %v387_v20 = vmul.f32 %v385_v19, %v383_v16 }
 0xca7   :  { %v390_v17 = vpop.permute.xlu2 %389 }
 0xca8   :  { %v392_v18 = vmul.f32 %v390_v17, %v383_v16 }
 0xcaa   :  { %394 = vrot.lane.b32.xlu0 %v392_v18, %s641_s17 }
 0xd1c   :  { %v395_v21 = vpop.permute.xlu0 %394 }
 0xd1d   :  { %v397_v22 = vadd.f32 %v395_v21, %v387_v20 }
 0xd1f   :  { %574 = vtanh.f32 %v397_v22  ;;  %v436_v43 = vrot.slane %v397_v22, 6 }
 0xd25   :  { %v575_v24 = vpop.eup %574 }
 0xd26   :  { %400 = vrot.lane.b32.xlu1 %v575_v24, %s640_s3 }
 0xd98   :  { %v401_v25 = vpop.permute.xlu1 %400 }
 0xd99   :  { %v403_v26 = vmul.f32 %v401_v25, %v383_v16 }
 0xd9b   :  { %v404_v28 = vpack.c.bf16 %v403_v26, %v403_v26 }
 0xd9d   :  { %v406_v30 = vrot.slane %v404_v28, 1 }
 0xd9f   :  { %407 = vrot.lane.b32.xlu2 %v406_v30, %s641_s17 }
 0xdf9   :  { %v408_v31 = vpop.permute.xlu2 %407 }
 0xdfa   :  { %542 = vmatmul.msk.bf16.vlgmr.msrb.gmra.mxu3 %vm113_vm5, %v408_v31 }
 0xe7d   :  { %v421_v32 = vpop.f32.mrf.mxu3 }
 0xe7e   :  { %v426_v33 = vrot.slane %v421_v32, 4 }
 0xe80   :  { %v428_v34 = vadd.f32 %v426_v33, %v756_v51 }
 0xe82   :  { %v429_v35 = vmul.f32 0.5, %v428_v34 }
 0xe84   :  { %v430_v36 = vsel %vm712_vm4, %v428_v34, %v429_v35 }
 0xe85   :  { %576 = vtanh.f32 %v430_v36  ;;  %v423_v37 = vpop.f32.mrf.mxu3 }
 0xe8b   :  { %v577_v38 = vpop.eup %576 }
 0xe8c   :  { %v432_v39 = vmul.f32 0.5, %v577_v38 }
 0xe8e   :  { %v433_v40 = vadd.f32 0.5, %v432_v39 }
 0xe90   :  { %v434_v41 = vsel %vm712_vm4, %v577_v38, %v433_v40 }
 0xe91   :  { %440 = vrot.lane.b32.xlu0 %v434_v41, %s640_s3  ;;  %v438_v44 = vmul.f32 %v436_v43, %v434_v41 }
 0xf03   :  { %v441_v42 = vpop.permute.xlu0 %440 }
 0xf04   :  { %v443_v27 = vmul.f32 %v441_v42, %v434_v41 }
 0xf06   :  { %445 = vrot.lane.b32.xlu1 %v443_v27, %s641_s17 }
 0xf78   :  { %v446_v45 = vpop.permute.xlu1 %445 }
 0xf79   :  { %v448_v46 = vadd.f32 %v446_v45, %v438_v44 }
 0xf7b   :  { %578 = vtanh.f32 %v448_v46  ;;  %v487_v1 = vrot.slane %v448_v46, 6 }
 0xf81   :  { %v579_v47 = vpop.eup %578 }
 0xf82   :  { %451 = vrot.lane.b32.xlu2 %v579_v47, %s640_s3 }
 0xfdc   :  { %v452_v48 = vpop.permute.xlu2 %451 }
 0xfdd   :  { %v454_v49 = vmul.f32 %v452_v48, %v434_v41 }
 0xfdf   :  { %v455_v50 = vpack.c.bf16 %v454_v49, %v454_v49 }
 0xfe1   :  { %v457_v52 = vrot.slane %v455_v50, 2 }
 0xfe3   :  { %458 = vrot.lane.b32.xlu0 %v457_v52, %s641_s17 }
0x1055   :  { %v459_v53 = vpop.permute.xlu0 %458 }
0x1056   :  { %543 = vmatmul.msk.bf16.vlgmr.msra.gmra.mxu0 %vm113_vm5, %v459_v53 }
0x10d3   :  { %v472_v54 = vpop.f32.mrf.mxu0 }
0x10d4   :  { %v477_v55 = vrot.slane %v472_v54, 2 }
0x10d6   :  { %v479_v56 = vadd.f32 %v477_v55, %v756_v51 }
0x10d8   :  { %v480_v57 = vmul.f32 0.5, %v479_v56 }
0x10da   :  { %v481_v58 = vsel %vm712_vm4, %v479_v56, %v480_v57 }
0x10db   :  { %580 = vtanh.f32 %v481_v58  ;;  %v474_v59 = vpop.f32.mrf.mxu0 }
0x10e1   :  { %v581_v60 = vpop.eup %580 }
0x10e2   :  { %v483_v61 = vmul.f32 0.5, %v581_v60 }
0x10e4   :  { %v484_v23 = vadd.f32 0.5, %v483_v61 }
0x10e6   :  { %v485_v62 = vsel %vm712_vm4, %v581_v60, %v484_v23 }
0x10e7   :  { %491 = vrot.lane.b32.xlu1 %v485_v62, %s640_s3  ;;  %v489_v51 = vmul.f32 %v487_v1, %v485_v62 }
0x1159   :  { %v492_v63 = vpop.permute.xlu1 %491 }
0x115a   :  { %v494_v0 = vmul.f32 %v492_v63, %v485_v62 }
0x115c   :  { %496 = vrot.lane.b32.xlu2 %v494_v0, %s641_s17 }
0x1164   :  { %513 = vrot.lane.b32.xlu2 %v512_v29, %s641_s17 }
0x11b6   :  { %v497_v2 = vpop.permute.xlu2 %496 }
0x11b7   :  { %v499_v3 = vadd.f32 %v497_v2, %v489_v51 }
0x11b9   :  { %582 = vtanh.f32 %v499_v3 }
0x11be   :  { %v514_v8 = vpop.permute.xlu2 %513 }
0x11bf   :  { %v583_v4 = vpop.eup %582 }
0x11c0   :  { %502 = vrot.lane.b32.xlu0 %v583_v4, %s640_s3 }
0x1232   :  { %v503_v6 = vpop.permute.xlu0 %502 }
0x1233   :  { %v505_v7 = vmul.f32 %v503_v6, %v485_v62 }
0x1235   :  { %508 = vrot.lane.b32.xlu1 %v505_v7, %s641_s17 }
0x12a7   :  { %v509_v9 = vpop.permute.xlu1 %508 }
0x12a8   :  { %v516_v10 = vsel %vm113_vm5, %v509_v9, %v514_v8 }
0x12a9   :  { %518 = vst.msk [vmem:[#allocation5 - $0x6] sm:$0xc0] %vm517_vm6, %v516_v10 }
0x12aa   :  { %529 = dma.vmem_to_hbm [thread:$0]  %s525_s21, 32, %s527_s24, [#allocation4]  }
0x12ab   :  { %634 = dma.done.wait [#allocation4], 32  }
0x12ac   :  { %635 = vsyncadd [#allocation4], 4294967264 }
0x12ad   :  { %534 = vsyncpa [#allocation3], 1 }
0x12ae   :  { %535 = vsyncpa [#allocation4], 1 }

</bundles_post_ra>
